<compile_context>
chip_gen: v7x
topology: tpu7x:2x2x1
jax: 0.10.0
libtpu: 0.0.40
codegen_flags: <defaults>
</compile_context>

<pallas_src>
from functools import partial
from itertools import combinations

import numpy as np
import jax
import jax.numpy as jnp
from jax import lax
from jax.experimental import pallas as pl
from jax.experimental.pallas import tpu as pltpu

MARGIN = 1.0  # cfg.LOSSES.CONTRASTIVE_LOSS.MARGIN

# Explicit scoped-VMEM budget: above v5e's 16 MiB default, below v7x's 64 MiB physical.
_VMEM_LIMIT = 48 * 1024 * 1024
_TILE_BUDGET = 40 * 1024 * 1024  # what we allow our own buffers to consume


def _round_up(x, m):
    return ((x + m - 1) // m) * m


# ---------------------------------------------------------------------------
# Kernel 1: upper-triangle tiled pairwise squared-distance matrix
#           (HardNegativePairSelector.pdist)
# ---------------------------------------------------------------------------
def _pdist_kernel(ti_ref, tj_ref, xi_ref, xj_ref, sqi_ref, sqj_ref, o_ref):
    # ti_ref / tj_ref are the scalar-prefetched tile coordinates (only used by the
    # index_maps); unused inside the body.
    del ti_ref, tj_ref
    # gram_ij = x_i . x_j  (contract last dims of both operands -> NT matmul on the MXU,
    # no explicit transpose of xj in the body).
    gram = lax.dot_general(
        xi_ref[...], xj_ref[...],
        dimension_numbers=(((1,), (1,)), ((), ())),
        preferred_element_type=jnp.float32,
    )                                                   # (TILE, TILE) f32
    # dist = |x_i|^2 + |x_j|^2 - 2 * x_i.x_j   (norms hoisted out of the kernel, f32)
    o_ref[...] = sqi_ref[...] + sqj_ref[...] - 2.0 * gram


def _pick_pdist_tile(npad, d, itemsize):
    # biggest square tile whose double-buffered working set fits the VMEM budget
    for tile in (1024, 512, 256, 128):
        if npad % tile:
            continue
        need = (4 * tile * d * itemsize        # 2 operands x 2 buffers
                + 2 * tile * tile * 4          # output tile x 2 buffers (f32)
                + 2 * tile * 128 * 4           # (tile,1) norm block, lane-padded
                + 2 * 8 * tile * 4)            # (1,tile) norm block, sublane-padded
        if need <= _TILE_BUDGET:
            return tile
    return 128  # npad is always a multiple of 128


def pdist(x, use_bf16_matmul=True):
    """Returns the PADDED (npad, npad) squared-distance matrix.

    Only tiles with tile_i <= tile_j (the upper triangle) are computed; all entries
    dist[i, j] with i < j (< n) are valid -- exactly the ones pair selection reads.
    """
    n, d = x.shape
    npad = _round_up(n, 128)          # lane-dense output stores even for small batches
    if npad != n:
        x = jnp.pad(x, ((0, npad - n), (0, 0)))

    # squared norms hoisted out of the per-tile body, always in f32
    xf = x.astype(jnp.float32)
    sq = jnp.sum(xf * xf, axis=1)
    sq_row = sq.reshape(npad, 1)
    sq_col = sq.reshape(1, npad)

    # MXU operands: bf16 for f32 inputs (ranking-only use of the matrix), f32 accumulate
    xm = x.astype(jnp.bfloat16) if (use_bf16_matmul and x.dtype == jnp.float32) else x

    tile = _pick_pdist_tile(npad, d, xm.dtype.itemsize)
    nt = npad // tile

    # Upper-triangle tile enumeration; (ti, tj) streamed in via scalar prefetch so the
    # skipped lower-triangle tiles never issue DMAs.
    tri = np.array([(i, j) for i in range(nt) for j in range(i, nt)], dtype=np.int32)
    ti = jnp.asarray(tri[:, 0])
    tj = jnp.asarray(tri[:, 1])

    out = pl.pallas_call(
        _pdist_kernel,
        out_shape=jax.ShapeDtypeStruct((npad, npad), jnp.float32),
        grid_spec=pltpu.PrefetchScalarGridSpec(
            num_scalar_prefetch=2,
            grid=(tri.shape[0],),
            in_specs=[
                pl.BlockSpec((tile, d), lambda t, ti_r, tj_r: (ti_r[t], 0)),  # X[ti]
                pl.BlockSpec((tile, d), lambda t, ti_r, tj_r: (tj_r[t], 0)),  # X[tj]
                pl.BlockSpec((tile, 1), lambda t, ti_r, tj_r: (ti_r[t], 0)),  # |x_i|^2
                pl.BlockSpec((1, tile), lambda t, ti_r, tj_r: (0, tj_r[t])),  # |x_j|^2
            ],
            out_specs=pl.BlockSpec((tile, tile),
                                   lambda t, ti_r, tj_r: (ti_r[t], tj_r[t])),
        ),
        compiler_params=pltpu.CompilerParams(
            dimension_semantics=("parallel",),        # each t writes a distinct tile
            vmem_limit_bytes=_VMEM_LIMIT),
    )(ti, tj, xm, xm, sq_row, sq_col)
    return out  # padded; no device-side crop (saves a full N^2 read+write pass)


# ---------------------------------------------------------------------------
# Kernel 2: fused contrastive pair loss, tiled over pairs, VMEM vector accumulator
# ---------------------------------------------------------------------------
def _loss_kernel(margin, num_pos, num_valid, tile_rows,
                 a_ref, b_ref, o_ref, acc_ref):
    pid = pl.program_id(0)

    @pl.when(pid == 0)
    def _init():
        acc_ref[...] = jnp.zeros_like(acc_ref)

    a = a_ref[...].astype(jnp.float32)
    b = b_ref[...].astype(jnp.float32)
    diff = a - b
    sq = jnp.sum(diff * diff, axis=1, keepdims=True)             # (TP, 1)

    # row index within the fused [positives | negatives | padding] array
    row = lax.broadcasted_iota(jnp.int32, sq.shape, 0) + pid * tile_rows
    w_pos = (row < num_pos).astype(jnp.float32)
    w_neg = jnp.logical_and(row >= num_pos, row < num_valid).astype(jnp.float32)

    neg_term = jnp.maximum(margin - jnp.sqrt(sq), 0.0) ** 2
    # per-step: pure elementwise accumulate into a (TP,1) VMEM vector
    acc_ref[...] = acc_ref[...] + w_pos * sq + w_neg * neg_term

    @pl.when(pid == pl.num_programs(0) - 1)
    def _finalize():
        # single cross-sublane reduce + scalar store, only once
        o_ref[...] = jnp.sum(acc_ref[...], keepdims=True) * (1.0 / float(num_valid))


def _pick_loss_tile(d, itemsize):
    for tp in (1024, 512, 256, 128):
        need = 4 * tp * d * itemsize + tp * 128 * 4   # 2 inputs x 2 bufs + accumulator
        if need <= _TILE_BUDGET:
            return tp
    return 128


def contrastive_pair_loss(embeddings, positive_pairs, negative_pairs, margin):
    d = embeddings.shape[1]
    p = int(len(positive_pairs))
    q = int(len(negative_pairs))
    r = p + q
    if r == 0:
        return jnp.float32(0.0)

    first = np.concatenate(
        [np.asarray(positive_pairs).reshape(-1, 2)[:, 0],
         np.asarray(negative_pairs).reshape(-1, 2)[:, 0]]
    ).astype(np.int32)
    second = np.concatenate(
        [np.asarray(positive_pairs).reshape(-1, 2)[:, 1],
         np.asarray(negative_pairs).reshape(-1, 2)[:, 1]]
    ).astype(np.int32)

    tp = min(_pick_loss_tile(d, embeddings.dtype.itemsize), _round_up(r, 8))
    rpad = _round_up(r, tp)
    if rpad != r:
        # pad the cheap int32 index vectors (padded rows gather row 0 and are masked),
        # NOT the gathered (R, D) float arrays.
        pad = rpad - r
        first = np.concatenate([first, np.zeros(pad, np.int32)])
        second = np.concatenate([second, np.zeros(pad, np.int32)])

    # Two XLA row-gathers (fused pos+neg), already at padded length -> no jnp.pad pass.
    a = jnp.take(embeddings, jnp.asarray(first), axis=0)          # (Rpad, D)
    b = jnp.take(embeddings, jnp.asarray(second), axis=0)         # (Rpad, D)

    out = pl.pallas_call(
        partial(_loss_kernel, float(margin), p, r, tp),
        out_shape=jax.ShapeDtypeStruct((1, 1), jnp.float32),
        grid_spec=pltpu.PrefetchScalarGridSpec(
            num_scalar_prefetch=0,
            grid=(rpad // tp,),
            in_specs=[
                pl.BlockSpec((tp, d), lambda i: (i, 0)),
                pl.BlockSpec((tp, d), lambda i: (i, 0)),
            ],
            out_specs=pl.BlockSpec((1, 1), lambda i: (0, 0)),
            scratch_shapes=[pltpu.VMEM((tp, 1), jnp.float32)],
        ),
        compiler_params=pltpu.CompilerParams(
            dimension_semantics=("arbitrary",),
            vmem_limit_bytes=_VMEM_LIMIT),
    )(a, b)
    return out[0, 0]


# ---------------------------------------------------------------------------
# Host-side pair selection (mirrors HardNegativePairSelector.get_pairs)
# Data-dependent output sizes -> stays in numpy glue, exactly like PyTorch does.
# Only reads dist_mat[i, j] with i < j, i.e. the computed upper triangle.
# ---------------------------------------------------------------------------
def hard_negative_pairs(dist_mat, labels):
    labels = np.asarray(labels)
    all_pairs = np.array(list(combinations(range(len(labels)), 2)))
    same = labels[all_pairs[:, 0]] == labels[all_pairs[:, 1]]
    positive_pairs = all_pairs[same.nonzero()]
    negative_pairs = all_pairs[(~same).nonzero()]
    negative_distances = np.asarray(dist_mat)[negative_pairs[:, 0], negative_pairs[:, 1]]
    k = len(positive_pairs)
    if len(negative_distances) == 0:
        top_negatives = np.zeros((0,), dtype=np.int64)
    elif k < len(negative_distances):
        top_negatives = np.argpartition(negative_distances, k)[:k]
    else:  # guard: fewer negatives than positives -> take them all (sorted)
        top_negatives = np.argsort(negative_distances)[:k]
    return positive_pairs, negative_pairs[top_negatives]


def online_contrastive_loss(embeddings, labels, margin=MARGIN, use_bf16_matmul=True):
    # distance matrix (upper-triangle Pallas kernel) -> host for data-dependent
    # pair selection (padded matrix is indexed directly with the original indices).
    dist = np.asarray(jax.device_get(pdist(embeddings, use_bf16_matmul=use_bf16_matmul)))
    pos, neg = hard_negative_pairs(dist, np.asarray(jax.device_get(labels)))
    return contrastive_pair_loss(embeddings, pos, neg, margin)


# ---------------------------------------------------------------------------
# Pure numpy references for sanity checking
# ---------------------------------------------------------------------------
def _np_pdist(x):
    x = np.asarray(x, dtype=np.float32)
    sq = (x ** 2).sum(1)
    return -2.0 * x @ x.T + sq[None, :] + sq[:, None]


def _np_pair_loss(x, pos, neg, margin):
    x = np.asarray(x, dtype=np.float32)
    pos_loss = ((x[pos[:, 0]] - x[pos[:, 1]]) ** 2).sum(1)
    neg_d = np.sqrt(((x[neg[:, 0]] - x[neg[:, 1]]) ** 2).sum(1))
    neg_loss = np.maximum(margin - neg_d, 0.0) ** 2
    return np.concatenate([pos_loss, neg_loss]).mean()


if __name__ == "__main__":
    key = jax.random.PRNGKey(0)
    N, D = 8, 32
    embeddings = jax.random.normal(key, (N, D), dtype=jnp.float32)
    labels = jnp.arange(N) % 2  # deterministic 4/4 class split
    x_np = np.asarray(embeddings)
    l_np = np.asarray(labels)

    # --- exact-parity path (f32 MXU operands): full end-to-end check vs the reference
    loss_exact = jax.block_until_ready(
        online_contrastive_loss(embeddings, labels, MARGIN, use_bf16_matmul=False))
    ref_pos, ref_neg = hard_negative_pairs(_np_pdist(x_np), l_np)
    ref_loss = _np_pair_loss(x_np, ref_pos, ref_neg, MARGIN)
    assert np.allclose(float(loss_exact), float(ref_loss), rtol=1e-4, atol=1e-4), (
        float(loss_exact), float(ref_loss))

    # --- default fast path (bf16 gram operands): check the computed upper triangle and
    #     the loss on the pairs it selects (ranking could differ only on near-ties).
    dist_dev = np.asarray(jax.device_get(pdist(embeddings)))     # padded, upper triangle
    iu = np.triu_indices(N, k=1)
    assert np.allclose(dist_dev[:N, :N][iu], _np_pdist(x_np)[iu], rtol=1e-2, atol=0.5)
    pos, neg = hard_negative_pairs(dist_dev, l_np)
    loss_fast = jax.block_until_ready(
        contrastive_pair_loss(embeddings, pos, neg, MARGIN))
    ref_fast = _np_pair_loss(x_np, pos, neg, MARGIN)
    assert np.allclose(float(loss_fast), float(ref_fast), rtol=1e-4, atol=1e-4), (
        float(loss_fast), float(ref_fast))

    print("KERNEL_OK")
</pallas_src>

<mosaic_0001>
module attributes {stable_mosaic.version = 11 : i64} {
  func.func @_pdist_kernel(%arg0: i32, %arg1: memref<1xi32, #tpu.memory_space<smem>>, %arg2: memref<1xi32, #tpu.memory_space<smem>>, %arg3: memref<128x32xf32, #tpu.memory_space<vmem>>, %arg4: memref<128x32xf32, #tpu.memory_space<vmem>>, %arg5: memref<128x1xf32, #tpu.memory_space<vmem>>, %arg6: memref<1x128xf32, #tpu.memory_space<vmem>>, %arg7: memref<128x128xf32, #tpu.memory_space<vmem>>) attributes {dimension_semantics = [#tpu.dimension_semantics<parallel>], iteration_bounds = array<i64: 1>, scalar_prefetch = 2 : i64, scratch_operands = 0 : i64, tpu.core_type = #tpu.core_type<tc>, window_params = [{transform_indices = @transform_0, window_bounds = array<i64: 128, 32>}, {transform_indices = @transform_1, window_bounds = array<i64: 128, 32>}, {transform_indices = @transform_2, window_bounds = array<i64: 128, 1>}, {transform_indices = @transform_3, window_bounds = array<i64: 1, 128>}, {transform_indices = @transform_4, window_bounds = array<i64: 128, 128>}]} {
    %c0 = arith.constant 0 : index
    %c0_0 = arith.constant 0 : index
    %0 = vector.load %arg3[%c0, %c0_0] : memref<128x32xf32, #tpu.memory_space<vmem>>, vector<128x32xf32>
    %c0_1 = arith.constant 0 : index
    %c0_2 = arith.constant 0 : index
    %1 = vector.load %arg4[%c0_1, %c0_2] : memref<128x32xf32, #tpu.memory_space<vmem>>, vector<128x32xf32>
    %cst = arith.constant dense<0.000000e+00> : vector<128x128xf32>
    %2 = tpu.matmul %0, %1, %cst {dimension_numbers = #tpu.dot_dimension_numbers<[1], [1], [0], [0], [0, 0, 1, 0], [], []>} : vector<128x32xf32>, vector<128x32xf32>, vector<128x128xf32> -> vector<128x128xf32>
    %c0_3 = arith.constant 0 : index
    %c0_4 = arith.constant 0 : index
    %3 = vector.load %arg5[%c0_3, %c0_4] : memref<128x1xf32, #tpu.memory_space<vmem>>, vector<128x1xf32>
    %c0_5 = arith.constant 0 : index
    %c0_6 = arith.constant 0 : index
    %4 = vector.load %arg6[%c0_5, %c0_6] : memref<1x128xf32, #tpu.memory_space<vmem>>, vector<1x128xf32>
    %5 = vector.broadcast %3 : vector<128x1xf32> to vector<128x128xf32>
    %6 = vector.broadcast %4 : vector<1x128xf32> to vector<128x128xf32>
    %7 = arith.addf %5, %6 : vector<128x128xf32>
    %cst_7 = arith.constant 2.000000e+00 : f32
    %8 = vector.broadcast %cst_7 : f32 to vector<128x128xf32>
    %9 = arith.mulf %8, %2 : vector<128x128xf32>
    %10 = arith.subf %7, %9 : vector<128x128xf32>
    %c0_8 = arith.constant 0 : index
    %c0_9 = arith.constant 0 : index
    %11 = vector.load %arg7[%c0_8, %c0_9] : memref<128x128xf32, #tpu.memory_space<vmem>>, vector<128x128xf32>
    tpu.vector_store %arg7[%c0_8, %c0_9], %10 {strides = array<i32>} : memref<128x128xf32, #tpu.memory_space<vmem>>, vector<128x128xf32>,
    return
  }
  func.func @transform_0(%arg0: i32, %arg1: memref<1xi32, #tpu.memory_space<smem>>, %arg2: memref<1xi32, #tpu.memory_space<smem>>) -> (i32, i32) {
    %0 = arith.index_cast %arg0 : i32 to index
    %1 = memref.load %arg1[%0] : memref<1xi32, #tpu.memory_space<smem>>
    %c0_i32 = arith.constant 0 : i32
    %c0_i32_0 = arith.constant 0 : i32
    return %1, %c0_i32 : i32, i32
  }
  func.func @transform_1(%arg0: i32, %arg1: memref<1xi32, #tpu.memory_space<smem>>, %arg2: memref<1xi32, #tpu.memory_space<smem>>) -> (i32, i32) {
    %0 = arith.index_cast %arg0 : i32 to index
    %1 = memref.load %arg2[%0] : memref<1xi32, #tpu.memory_space<smem>>
    %c0_i32 = arith.constant 0 : i32
    %c0_i32_0 = arith.constant 0 : i32
    return %1, %c0_i32 : i32, i32
  }
  func.func @transform_2(%arg0: i32, %arg1: memref<1xi32, #tpu.memory_space<smem>>, %arg2: memref<1xi32, #tpu.memory_space<smem>>) -> (i32, i32) {
    %0 = arith.index_cast %arg0 : i32 to index
    %1 = memref.load %arg1[%0] : memref<1xi32, #tpu.memory_space<smem>>
    %c0_i32 = arith.constant 0 : i32
    %c0_i32_0 = arith.constant 0 : i32
    return %1, %c0_i32 : i32, i32
  }
  func.func @transform_3(%arg0: i32, %arg1: memref<1xi32, #tpu.memory_space<smem>>, %arg2: memref<1xi32, #tpu.memory_space<smem>>) -> (i32, i32) {
    %0 = arith.index_cast %arg0 : i32 to index
    %1 = memref.load %arg2[%0] : memref<1xi32, #tpu.memory_space<smem>>
    %c0_i32 = arith.constant 0 : i32
    %c0_i32_0 = arith.constant 0 : i32
    return %c0_i32, %1 : i32, i32
  }
  func.func @transform_4(%arg0: i32, %arg1: memref<1xi32, #tpu.memory_space<smem>>, %arg2: memref<1xi32, #tpu.memory_space<smem>>) -> (i32, i32) {
    %0 = arith.index_cast %arg0 : i32 to index
    %1 = memref.load %arg1[%0] : memref<1xi32, #tpu.memory_space<smem>>
    %2 = arith.index_cast %arg0 : i32 to index
    %3 = memref.load %arg2[%2] : memref<1xi32, #tpu.memory_space<smem>>
    %c0_i32 = arith.constant 0 : i32
    return %1, %3 : i32, i32
  }
}

</mosaic_0001>

<bundles_post_ra>
// kernel: tpu_custom_call.1
= control target key start
LH: loop header
LB: loop body
LE: loop exit
PB: predicated region body
PF: predicated region fallthrough
CT: control target
= control target key end

     0   :  { %s1076_s0 = inlined_call_operand.<no memory space> [shape: s32[1], index: 0, kind: input, shape index: {}]   ;;  %s1077_s1 = inlined_call_operand.<no memory space> [shape: s32[1], index: 1, kind: input, shape index: {}]   ;;  %s1078_s2 = inlined_call_operand.vmem [shape: f32[128,32], index: 2, kind: input, shape index: {}]   ;;  %s1079_s3 = inlined_call_operand.vmem [shape: f32[128,32], index: 3, kind: input, shape index: {}]   ;;  %s1080_s4 = inlined_call_operand.vmem [shape: f32[128,1], index: 4, kind: input, shape index: {}]   ;;  %s1081_s5 = inlined_call_operand.vmem [shape: f32[1,128], index: 5, kind: input, shape index: {}]   ;;  %s1082_s6 = inlined_call_operand.hbm [shape: f32[128,128], index: 6, kind: output, shape index: {}]  }
   0x1   :  { %s595_s23 = sshll.u32 %s1077_s1, 4  ;;  %s863_s26 = sshll.u32 %s1076_s0, 4 }
   0x2   :  { %13 = vsyncpa [#allocation6], 0  ;;  %p83_p0 = scmp.lt.s32.totalorder %s595_s23, 15  ;;  %p75_p1 = scmp.lt.s32.totalorder %s863_s26, 15  ;;  %v818_v0 = vmov 0   ;;  %vm137_vm0 = vcmask 261120  }
   0x3   :  { %791 = vset.pattern.permute.xlu1 %v818_v0  ;;  %790 = vset.pattern.permute.xlu0 %v818_v0  ;;  %vm874_vm1 = vmpackc.low %vm137_vm0, %vm137_vm0  ;;  %p98_p2 = scmp.lt.s32.totalorder %s1077_s1, 0  ;;  %s554_s20 = sadd.s32 %s863_s26, %s1077_s1 }
   0x4   :  { %s1086_s23 = smov (!%p83_p0, %s595_s23), 15  ;;  %s819_s21 = smov [#allocation5]  }
   0x5   :  { %s76_s27 = scalar_select %p75_p1, %s863_s26, 15 }
   0x6   :  { %s596_s28 = sshll.u32 %s1086_s23, 3  ;;  %s557_s22 = sshll.u32 %s819_s21, 4  ;;  %s1058_s22 = int_to_ptr.vmem [resolvable:$true] %s557_s22 }
   0x7   :  { %s870_s7 = scalar_lea.vmem %s1079_s3, %s596_s28  ;;  %s594_s0 = sshll.u32 %s76_s27, 3 }
   0x8   :  { %v121_v2 = vld [vmem:[%s870_s7] sm:$0xff]  ;;  %v122_v3 = vld [vmem:[%s870_s7 + $0x8] sm:$0xff]  ;;  %v123_v4 = vld [vmem:[%s870_s7 + $0x10] sm:$0xff]  ;;  %s885_s9 = scalar_lea.vmem %s1078_s2, %s594_s0  ;;  %s908_s11 = scalar_lea.vmem %s1080_s4, %s594_s0 }
   0x9   :  { %v722_v5 = vpack.c.bf16 %v122_v3, %v121_v2  ;;  %v124_v6 = vld [vmem:[%s870_s7 + $0x18] sm:$0xff]  ;;  %v105_v8 = vld [vmem:[%s885_s9] sm:$0xff]  ;;  %v126_v11 = vld [vmem:[%s870_s7 + $0x28] sm:$0xff]  ;;  %s99_s15 = scalar_select %p98_p2, %s1077_s1, 0 }
   0xa   :  { %v728_v7 = vpack.c.bf16 %v124_v6, %v123_v4  ;;  %v113_v9 = vld [vmem:[%s885_s9 + $0x40] sm:$0xff]  ;;  %698 = vmatprep.mubr.msk.f32.mxu0 %vm137_vm0, %v105_v8  ;;  %v381_v13 = vld [vmem:[%s908_s11 + $0x10] sm:$0xff]  ;;  %v382_v15 = vld [vmem:[%s908_s11 + $0x18] sm:$0xff]  ;;  %s633_s1 = sshll.u32 %s554_s20, 7  ;;  %s792_s26 = scalar_lea.vmem %s1058_s22, 2048 }
   0xb   :  { %724 = vmatprep.subr.msk.bf16.mxu0 %vm874_vm1, %v722_v5  ;;  %770 = vmatprep.subr.msk.bf16.mxu1 %vm874_vm1, %v722_v5  ;;  %v125_v10 = vld [vmem:[%s870_s7 + $0x20] sm:$0xff]  ;;  %v127_v16 = vld [vmem:[%s870_s7 + $0x30] sm:$0xff]  ;;  %v128_v17 = vld [vmem:[%s870_s7 + $0x38] sm:$0xff]  ;;  %s100_s18 = scalar_lea.vmem %s1081_s5, %s99_s15  ;;  %s1056_s25 = scalar_lea.hbm %s1082_s6, %s633_s1 }
   0xc   :  { %727 = vmatpush3.bf16.xpose.msk.msra.mxu0 %vm874_vm1, %v722_v5  ;;  %778 = vmatpush3.bf16.xpose.msk.msra.mxu1 %vm874_vm1, %v722_v5  ;;  %v734_v12 = vpack.c.bf16 %v126_v11, %v125_v10  ;;  %v379_v14 = vld [vmem:[%s908_s11] sm:$0xff]  ;;  %v380_v18 = vld [vmem:[%s908_s11 + $0x8] sm:$0xff]  ;;  %v740_v20 = vpack.c.bf16 %v128_v17, %v127_v16  ;;  %v386_v22 = vld [vmem:[%s908_s11 + $0x38] sm:$0xff]  ;;  %p793_p3 = scmp.ne.s32.totalorder %s1058_s22, %s792_s26  ;;  %p797_p4 = scmp.lt.s32.totalorder %s1058_s22, %s1058_s22 }
   0xd   :  { %730 = vmatprep.subr.msk.bf16.mxu0 %vm874_vm1, %v728_v7  ;;  %771 = vmatprep.subr.msk.bf16.mxu1 %vm874_vm1, %v728_v7  ;;  %v384_v19 = vld [vmem:[%s908_s11 + $0x28] sm:$0xff]  ;;  %v383_v21 = vld [vmem:[%s908_s11 + $0x20] sm:$0xff]  ;;  %v385_v25 = vld [vmem:[%s908_s11 + $0x30] sm:$0xff]  ;;  %p798_p5 = scmp.lt.s32.totalorder %s792_s26, %s792_s26 }
   0xe   :  { %710 = vmatprep.mubr.msk.f32.mxu1 %vm137_vm0, %v113_v9  ;;  %408 = vperm.xlu1 %791, %v381_v13   ;;  %v129_v23 = vld [vmem:[%s870_s7 + $0x40] sm:$0xff]  ;;  %v130_v24 = vld [vmem:[%s870_s7 + $0x48] sm:$0xff]  ;;  %v390_v29 = vld [vmem:[%s908_s11 + $0x58] sm:$0xff] }
   0xf   :  { %398 = vperm.xlu0 %790, %v379_v14   ;;  %v388_v26 = vld [vmem:[%s908_s11 + $0x48] sm:$0xff]  ;;  %v746_v27 = vpack.c.bf16 %v130_v24, %v129_v23  ;;  %v387_v28 = vld [vmem:[%s908_s11 + $0x40] sm:$0xff]  ;;  %v131_v30 = vld [vmem:[%s870_s7 + $0x50] sm:$0xff]  ;;  %p799_p6 = por %p798_p5, %p797_p4 }
  0x10   :  { %v132_v31 = vld [vmem:[%s870_s7 + $0x58] sm:$0xff]  ;;  %v389_v32 = vld [vmem:[%s908_s11 + $0x50] sm:$0xff]  ;;  %v392_v33 = vld [vmem:[%s908_s11 + $0x68] sm:$0xff] }
  0x11   :  { %v752_v34 = vpack.c.bf16 %v132_v31, %v131_v30  ;;  %v391_v35 = vld [vmem:[%s908_s11 + $0x60] sm:$0xff]  ;;  %v394_v36 = vld [vmem:[%s908_s11 + $0x78] sm:$0xff]  ;;  %v134_v38 = vld [vmem:[%s870_s7 + $0x68] sm:$0xff]  ;;  %p800_p7 = pnand %p799_p6, %p793_p3 }
  0x12   :  { %413 = vperm.xlu1 %791, %v382_v15   ;;  %v133_v37 = vld [vmem:[%s870_s7 + $0x60] sm:$0xff]  ;;  %v393_v39 = vld [vmem:[%s908_s11 + $0x70] sm:$0xff]  ;;  %v136_v42 = vld [vmem:[%s870_s7 + $0x78] sm:$0xff] }
  0x13   :  { %403 = vperm.xlu0 %790, %v380_v18   ;;  %v758_v40 = vpack.c.bf16 %v134_v38, %v133_v37  ;;  %v135_v41 = vld [vmem:[%s870_s7 + $0x70] sm:$0xff]  ;;  %v106_v44 = vld [vmem:[%s885_s9 + $0x8] sm:$0xff]  ;;  %v108_v48 = vld [vmem:[%s885_s9 + $0x18] sm:$0xff] }
  0x14   :  { %733 = vmatpush3.bf16.xpose.msk.msra.mxu0 %vm874_vm1, %v728_v7  ;;  %779 = vmatpush3.bf16.xpose.msk.msra.mxu1 %vm874_vm1, %v728_v7  ;;  %v764_v43 = vpack.c.bf16 %v136_v42, %v135_v41  ;;  %v114_v45 = vld [vmem:[%s885_s9 + $0x48] sm:$0xff]  ;;  %v107_v46 = vld [vmem:[%s885_s9 + $0x10] sm:$0xff]  ;;  %v116_v49 = vld [vmem:[%s885_s9 + $0x58] sm:$0xff] }
  0x15   :  { %736 = vmatprep.subr.msk.bf16.mxu0 %vm874_vm1, %v734_v12  ;;  %772 = vmatprep.subr.msk.bf16.mxu1 %vm874_vm1, %v734_v12  ;;  %v115_v47 = vld [vmem:[%s885_s9 + $0x50] sm:$0xff]  ;;  %v109_v50 = vld [vmem:[%s885_s9 + $0x20] sm:$0xff]  ;;  %v110_v52 = vld [vmem:[%s885_s9 + $0x28] sm:$0xff] }
  0x16   :  { %423 = vperm.xlu1 %791, %v384_v19   ;;  %v117_v51 = vld [vmem:[%s885_s9 + $0x60] sm:$0xff]  ;;  %v118_v53 = vld [vmem:[%s885_s9 + $0x68] sm:$0xff]  ;;  %v111_v54 = vld [vmem:[%s885_s9 + $0x30] sm:$0xff] }
  0x17   :  { %418 = vperm.xlu0 %790, %v383_v21   ;;  %v119_v55 = vld [vmem:[%s885_s9 + $0x70] sm:$0xff]  ;;  %v112_v56 = vld [vmem:[%s885_s9 + $0x38] sm:$0xff]  ;;  %v1029_v6 = vld [vmem:[%s100_s18] ss:$0 sm:$0xff] }
  0x18   :  { %v120_v57 = vld [vmem:[%s885_s9 + $0x78] sm:$0xff] }
  0x1a   :  { %433 = vperm.xlu1 %791, %v386_v22  }
  0x1b   :  { %428 = vperm.xlu0 %790, %v385_v25  }
  0x1c   :  { %739 = vmatpush3.bf16.xpose.msk.msra.mxu0 %vm874_vm1, %v734_v12  ;;  %780 = vmatpush3.bf16.xpose.msk.msra.mxu1 %vm874_vm1, %v734_v12 }
  0x1d   :  { %742 = vmatprep.subr.msk.bf16.mxu0 %vm874_vm1, %v740_v20  ;;  %773 = vmatprep.subr.msk.bf16.mxu1 %vm874_vm1, %v740_v20 }
  0x1e   :  { %443 = vperm.xlu1 %791, %v388_v26  }
  0x1f   :  { %438 = vperm.xlu0 %790, %v387_v28  }
  0x22   :  { %453 = vperm.xlu1 %791, %v390_v29  }
  0x23   :  { %448 = vperm.xlu0 %790, %v389_v32  }
  0x24   :  { %745 = vmatpush3.bf16.xpose.msk.msra.mxu0 %vm874_vm1, %v740_v20  ;;  %781 = vmatpush3.bf16.xpose.msk.msra.mxu1 %vm874_vm1, %v740_v20 }
  0x25   :  { %748 = vmatprep.subr.msk.bf16.mxu0 %vm874_vm1, %v746_v27  ;;  %774 = vmatprep.subr.msk.bf16.mxu1 %vm874_vm1, %v746_v27 }
  0x26   :  { %463 = vperm.xlu1 %791, %v392_v33  }
  0x27   :  { %458 = vperm.xlu0 %790, %v391_v35  }
  0x2a   :  { %473 = vperm.xlu1 %791, %v394_v36  }
  0x2b   :  { %468 = vperm.xlu0 %790, %v393_v39  }
  0x2c   :  { %751 = vmatpush3.bf16.xpose.msk.msra.mxu0 %vm874_vm1, %v746_v27  ;;  %782 = vmatpush3.bf16.xpose.msk.msra.mxu1 %vm874_vm1, %v746_v27 }
  0x2d   :  { %754 = vmatprep.subr.msk.bf16.mxu0 %vm874_vm1, %v752_v34  ;;  %775 = vmatprep.subr.msk.bf16.mxu1 %vm874_vm1, %v752_v34 }
  0x34   :  { %757 = vmatpush3.bf16.xpose.msk.msra.mxu0 %vm874_vm1, %v752_v34  ;;  %783 = vmatpush3.bf16.xpose.msk.msra.mxu1 %vm874_vm1, %v752_v34 }
  0x35   :  { %760 = vmatprep.subr.msk.bf16.mxu0 %vm874_vm1, %v758_v40  ;;  %776 = vmatprep.subr.msk.bf16.mxu1 %vm874_vm1, %v758_v40 }
  0x3c   :  { %763 = vmatpush3.bf16.xpose.msk.msra.mxu0 %vm874_vm1, %v758_v40  ;;  %784 = vmatpush3.bf16.xpose.msk.msra.mxu1 %vm874_vm1, %v758_v40 }
  0x3d   :  { %766 = vmatprep.subr.msk.bf16.mxu0 %vm874_vm1, %v764_v43  ;;  %777 = vmatprep.subr.msk.bf16.mxu1 %vm874_vm1, %v764_v43 }
  0x44   :  { %769 = vmatpush3.bf16.xpose.msk.msra.mxu0 %vm874_vm1, %v764_v43  ;;  %785 = vmatpush3.bf16.xpose.msk.msra.mxu1 %vm874_vm1, %v764_v43 }
  0x4b   :  { %699 = vmatmul.mubr.msk.f32.vlgmr.msra.gmra.mrb[0].mxu0 %vm137_vm0, %v106_v44  ;;  %711 = vmatmul.mubr.msk.f32.vlgmr.msra.gmra.mrb[0].mxu1 %vm137_vm0, %v114_v45 }
  0x4c   :  { %701 = vmatprep.mubr.msk.f32.mxu0 %vm137_vm0, %v107_v46  ;;  %713 = vmatprep.mubr.msk.f32.mxu1 %vm137_vm0, %v115_v47 }
  0x4f   :  { %702 = vmatmul.mubr.msk.f32.gmra.mrb[2].mxu0 %vm137_vm0, %v108_v48  ;;  %714 = vmatmul.mubr.msk.f32.gmra.mrb[2].mxu1 %vm137_vm0, %v116_v49 }
  0x50   :  { %704 = vmatprep.mubr.msk.f32.mxu0 %vm137_vm0, %v109_v50  ;;  %716 = vmatprep.mubr.msk.f32.mxu1 %vm137_vm0, %v117_v51 }
  0x53   :  { %705 = vmatmul.mubr.msk.f32.gmra.mrb[4].mxu0 %vm137_vm0, %v110_v52  ;;  %717 = vmatmul.mubr.msk.f32.gmra.mrb[4].mxu1 %vm137_vm0, %v118_v53 }
  0x54   :  { %707 = vmatprep.mubr.msk.f32.mxu0 %vm137_vm0, %v111_v54  ;;  %719 = vmatprep.mubr.msk.f32.mxu1 %vm137_vm0, %v119_v55 }
  0x57   :  { %708 = vmatmul.mubr.msk.f32.gmra.mrb[6].mxu0 %vm137_vm0, %v112_v56  ;;  %720 = vmatmul.mubr.msk.f32.gmra.mrb[6].mxu1 %vm137_vm0, %v120_v57 }
  0x8d   :  { %v409_v58 = vpop.permute.xlu1 %408 }
  0x8e   :  { %v399_v59 = vpop.permute.xlu0 %398  ;;  %v484_v33 = vadd.f32 %v1029_v6, %v409_v58 }
  0x8f   :  { %v482_v15 = vadd.f32 %v1029_v6, %v399_v59 }
  0x91   :  { %v414_v60 = vpop.permute.xlu1 %413 }
  0x92   :  { %v404_v61 = vpop.permute.xlu0 %403  ;;  %v485_v27 = vadd.f32 %v1029_v6, %v414_v60 }
  0x93   :  { %v483_v9 = vadd.f32 %v1029_v6, %v404_v61 }
  0x95   :  { %v424_v62 = vpop.permute.xlu1 %423 }
  0x96   :  { %v419_v63 = vpop.permute.xlu0 %418  ;;  %v487_v43 = vadd.f32 %v1029_v6, %v424_v62 }
  0x97   :  { %v486_v49 = vadd.f32 %v1029_v6, %v419_v63 }
  0x99   :  { %v1016_v0 = vpop.permute.xlu1 %433 }
  0x9a   :  { %v1018_v1 = vpop.permute.xlu0 %428  ;;  %v489_v61 = vadd.f32 %v1029_v6, %v1016_v0 }
  0x9d   :  { %v444_v2 = vpop.permute.xlu1 %443 }
  0x9e   :  { %v439_v3 = vpop.permute.xlu0 %438  ;;  %v491_v10 = vadd.f32 %v1029_v6, %v444_v2 }
  0x9f   :  { %v490_v16 = vadd.f32 %v1029_v6, %v439_v3 }
  0xa1   :  { %v454_v4 = vpop.permute.xlu1 %453 }
  0xa2   :  { %v449_v5 = vpop.permute.xlu0 %448  ;;  %v493_v28 = vadd.f32 %v1029_v6, %v454_v4 }
  0xa3   :  { %v492_v34 = vadd.f32 %v1029_v6, %v449_v5  ;;  %v488_v5 = vadd.f32 %v1029_v6, %v1018_v1 }
  0xa5   :  { %v464_v19 = vpop.permute.xlu1 %463 }
  0xa6   :  { %v459_v20 = vpop.permute.xlu0 %458  ;;  %v495_v44 = vadd.f32 %v1029_v6, %v464_v19 }
  0xa7   :  { %v494_v50 = vadd.f32 %v1029_v6, %v459_v20 }
  0xa9   :  { %v474_v51 = vpop.permute.xlu1 %473 }
  0xaa   :  { %v469_v54 = vpop.permute.xlu0 %468  ;;  %v497_v62 = vadd.f32 %v1029_v6, %v474_v51 }
 0x11e   :  { %v700_v7 = vpop.f32.mrb[0].mxu0  ;;  %v712_v8 = vpop.f32.mrb[0].mxu1 }
 0x11f   :  { %v499_v11 = vmul.f32 2.0, %v700_v7  ;;  %v507_v12 = vmul.f32 2.0, %v712_v8  ;;  %v300_v13 = vpop.f32.mrb[1].mxu0  ;;  %v340_v14 = vpop.f32.mrb[1].mxu1  ;;  %v496_v7 = vadd.f32 %v1029_v6, %v469_v54 }
 0x120   :  { %v498_v17 = vmul.f32 2.0, %v300_v13  ;;  %v506_v18 = vmul.f32 2.0, %v340_v14 }
 0x121   :  { %v515_v21 = vsub.f32 %v483_v9, %v499_v11  ;;  %v523_v22 = vsub.f32 %v491_v10, %v507_v12 }
 0x122   :  { %v514_v23 = vsub.f32 %v482_v15, %v498_v17  ;;  %v522_v24 = vsub.f32 %v490_v16, %v506_v18  ;;  %v703_v25 = vpop.f32.mrb[2].mxu0  ;;  %v715_v26 = vpop.f32.mrb[2].mxu1 }
 0x123   :  { %531 = vst [vmem:[#allocation5 + $0x8] sm:$0xff] %v515_v21  ;;  %539 = vst [vmem:[#allocation5 + $0x48] sm:$0xff] %v523_v22  ;;  %v501_v29 = vmul.f32 2.0, %v703_v25  ;;  %v509_v30 = vmul.f32 2.0, %v715_v26  ;;  %v310_v31 = vpop.f32.mrb[3].mxu0  ;;  %v350_v32 = vpop.f32.mrb[3].mxu1 }
 0x124   :  { %530 = vst [vmem:[#allocation5] sm:$0xff] %v514_v23  ;;  %538 = vst [vmem:[#allocation5 + $0x40] sm:$0xff] %v522_v24  ;;  %v500_v35 = vmul.f32 2.0, %v310_v31  ;;  %v508_v36 = vmul.f32 2.0, %v350_v32 }
 0x125   :  { %v517_v37 = vsub.f32 %v485_v27, %v501_v29  ;;  %v525_v38 = vsub.f32 %v493_v28, %v509_v30 }
 0x126   :  { %v516_v39 = vsub.f32 %v484_v33, %v500_v35  ;;  %v524_v40 = vsub.f32 %v492_v34, %v508_v36  ;;  %v706_v41 = vpop.f32.mrb[4].mxu0  ;;  %v718_v42 = vpop.f32.mrb[4].mxu1 }
 0x127   :  { %533 = vst [vmem:[#allocation5 + $0x18] sm:$0xff] %v517_v37  ;;  %541 = vst [vmem:[#allocation5 + $0x58] sm:$0xff] %v525_v38  ;;  %v503_v45 = vmul.f32 2.0, %v706_v41  ;;  %v511_v46 = vmul.f32 2.0, %v718_v42  ;;  %v320_v47 = vpop.f32.mrb[5].mxu0  ;;  %v360_v48 = vpop.f32.mrb[5].mxu1 }
 0x128   :  { %532 = vst [vmem:[#allocation5 + $0x10] sm:$0xff] %v516_v39  ;;  %540 = vst [vmem:[#allocation5 + $0x50] sm:$0xff] %v524_v40  ;;  %v502_v52 = vmul.f32 2.0, %v320_v47  ;;  %v510_v53 = vmul.f32 2.0, %v360_v48 }
 0x129   :  { %v519_v55 = vsub.f32 %v487_v43, %v503_v45  ;;  %v527_v56 = vsub.f32 %v495_v44, %v511_v46 }
 0x12a   :  { %v518_v57 = vsub.f32 %v486_v49, %v502_v52  ;;  %v526_v58 = vsub.f32 %v494_v50, %v510_v53  ;;  %v709_v59 = vpop.f32.mrb[6].mxu0  ;;  %v721_v60 = vpop.f32.mrb[6].mxu1 }
 0x12b   :  { %535 = vst [vmem:[#allocation5 + $0x28] sm:$0xff] %v519_v55  ;;  %543 = vst [vmem:[#allocation5 + $0x68] sm:$0xff] %v527_v56  ;;  %v505_v63 = vmul.f32 2.0, %v709_v59  ;;  %v513_v2 = vmul.f32 2.0, %v721_v60  ;;  %v330_v3 = vpop.f32.mrb[7].mxu0  ;;  %v370_v4 = vpop.f32.mrb[7].mxu1 }
 0x12c   :  { %534 = vst [vmem:[#allocation5 + $0x20] sm:$0xff] %v518_v57  ;;  %542 = vst [vmem:[#allocation5 + $0x60] sm:$0xff] %v526_v58  ;;  %v504_v8 = vmul.f32 2.0, %v330_v3  ;;  %v512_v9 = vmul.f32 2.0, %v370_v4 }
 0x12d   :  { %v521_v0 = vsub.f32 %v489_v61, %v505_v63  ;;  %v529_v10 = vsub.f32 %v497_v62, %v513_v2 }
 0x12e   :  { %v520_v11 = vsub.f32 %v488_v5, %v504_v8  ;;  %v528_v1 = vsub.f32 %v496_v7, %v512_v9 }
 0x12f   :  { %537 = vst [vmem:[#allocation5 + $0x38] sm:$0xff] %v521_v0  ;;  %545 = vst [vmem:[#allocation5 + $0x78] sm:$0xff] %v529_v10 }
 0x130   :  { %536 = vst [vmem:[#allocation5 + $0x30] sm:$0xff] %v520_v11  ;;  %544 = vst [vmem:[#allocation5 + $0x70] sm:$0xff] %v528_v1 }
 0x131   :  { %803 = shalt.err (!%p800_p7)
}
 0x132   :  { %s804_s27 = scalar_lea.hbm %s1056_s25, 2048  ;;  %s806_s30 = scalar_lea.hbm %s1082_s6, 2048 }
 0x133   :  { %p805_p8 = scmp.ne.s32.totalorder %s1056_s25, %s804_s27  ;;  %p807_p9 = scmp.lt.u32.totalorder %s1056_s25, %s1082_s6 }
 0x134   :  { %p808_p10 = scmp.lt.u32.totalorder %s806_s30, %s804_s27  ;;  %p810_p12 = scmp.lt.u32.totalorder %s804_s27, %s1056_s25 }
 0x136   :  { %p809_p11 = por %p808_p10, %p807_p9 }
 0x138   :  { %p811_p13 = por %p810_p12, %p809_p11 }
 0x13a   :  { %p812_p0 = pnand %p811_p13, %p805_p8 }
 0x13c   :  { %815 = shalt.err (!%p812_p0)
}
 0x13d   :  { %s820_s3 = smov 128   ;;  %s821_s8 = smov 8  }
 0x13e   :  { %563 = dma.vmem_to_hbm [thread:$0]  %s1058_s22, 2048, %s1056_s25, [#allocation6], %s820_s3, %s820_s3, %s821_s8  }
 0x13f   :  { %816 = dma.done.wait [#allocation6], 2048  }
 0x140   :  { %817 = vsyncadd [#allocation6], 4294965248 }
 0x141   :  { %567 = vsyncpa [#allocation6], 1 }

</bundles_post_ra>
